<compile_context>
chip_gen: v7x
topology: tpu7x:2x2x1
jax: 0.10.0
libtpu: 0.0.40
codegen_flags: <defaults>
</compile_context>

<pallas_src>
import math
from functools import partial

import jax
import jax.numpy as jnp
import numpy as np
from jax.experimental import pallas as pl
from jax.experimental.pallas import tpu as pltpu

HI = jax.lax.Precision.HIGHEST   # reference path only


def generator_kernel(z_ref, conv_ref, wc_ref, slab_ref, pred_ref, *,
                     batch, window, hidden, output_len):
    B, W, H = batch, window, hidden
    L = z_ref.shape[1]
    FL = conv_ref.shape[1]

    # ---------- front end: batched over all B*W rows (3 MXU dots total) -----
    z_bf = z_ref[...].astype(jnp.bfloat16)                         # (B*W, L)
    conv_pack = conv_ref[...]                                      # (L+1, FL) bf16
    cm, cb = conv_pack[:L], conv_pack[L:L + 1]
    conv_act = jnp.maximum(
        jnp.dot(z_bf, cm, preferred_element_type=jnp.float32) + cb, 0.0)

    wc_pack = wc_ref[...]                                          # (FL+1, H) bf16
    wc, bc = wc_pack[:FL], wc_pack[FL:FL + 1]
    h_all = jnp.maximum(
        jnp.dot(conv_act.astype(jnp.bfloat16), wc,
                preferred_element_type=jnp.float32) + bc, 0.0)     # (B*W, H)

    # ---------- unpack the single f32 weight slab ----------------------------
    slab = slab_ref[...]
    wd_full  = slab[0:2 * H, 0:H]                    # Wd.T               (2H, H)
    ud       = slab[2 * H:3 * H, 0:H]                # Ud.T               (H, H)
    lstm     = slab[3 * H:4 * H + 2, :]              # [Whh.T; Wih; bias] (H+2, 4H)
    vd_row   = slab[4 * H + 2:4 * H + 3, 0:H]        # vd                 (1, H)
    wo_row   = slab[4 * H + 2:4 * H + 3, H:2 * H]    # Wo[:, :H]          (1, H)
    prev_col = slab[4 * H + 3:4 * H + 3 + B, 0:1]    # y_real*Wo[0,H]+bo  (B, 1)

    ud_h_all = jnp.dot(h_all, ud, preferred_element_type=jnp.float32)  # (B*W, H)

    h_3d     = h_all.reshape(B, W, H)
    ud_h_3d  = ud_h_all.reshape(B, W, H)
    vd_b     = vd_row.reshape(1, 1, H)
    ones_col = jnp.ones((B, 1), jnp.float32)

    # ---------- decode recurrence: batched over B, serial (unrolled) over t --
    # TODO(synk): switch to lax.fori_loop carrying (state, ys) if output_len grows.
    state = jnp.zeros((B, 2 * H), jnp.float32)       # packed [d | s]
    ys = []
    for _ in range(output_len):
        d = state[:, 0:H]
        # attention over the W encoder positions, per batch row
        wd_ds = jnp.dot(state, wd_full, preferred_element_type=jnp.float32)  # (B, H)
        e = jnp.tanh(wd_ds[:, None, :] + ud_h_3d)                            # (B, W, H)
        l = jnp.sum(e * vd_b, axis=-1, keepdims=True)                        # (B, W, 1)
        # logits are tanh-bounded -> no max-subtraction needed for exp safety.
        p = jnp.exp(l)
        attn = p * pl.reciprocal(jnp.sum(p, axis=1, keepdims=True),
                                 approx=True)                                 # (B, W, 1)
        # TODO(synk): c_t could be a batched MXU matvec (einsum 'b1w,bwh->b1h');
        # kept as VPU mul + sublane reduce for lowering robustness.
        c_t = jnp.sum(attn * h_3d, axis=1)                                    # (B, H)
        y_t = jnp.sum(c_t * wo_row, axis=-1, keepdims=True) + prev_col        # (B, 1)
        ys.append(y_t)
        # fused LSTM gate pre-activation: [d | y | 1] @ [Whh.T; Wih; bias];
        # gate columns packed [i, f, o, g].
        gates = jnp.dot(jnp.concatenate([d, y_t, ones_col], axis=1), lstm,
                        preferred_element_type=jnp.float32)                   # (B, 4H)
        ifo = jax.nn.sigmoid(gates[:, 0:3 * H])
        g_g = jnp.tanh(gates[:, 3 * H:4 * H])
        i_g, f_g, o_g = ifo[:, 0:H], ifo[:, H:2 * H], ifo[:, 2 * H:3 * H]
        s_new = f_g * state[:, H:2 * H] + i_g * g_g
        d_new = o_g * jnp.tanh(s_new)
        state = jnp.concatenate([d_new, s_new], axis=1)

    pred_ref[...] = jnp.concatenate(ys, axis=1)                               # (B, T_out)


def init_params(key, hidden, num_filter, kernel_size):
    """Deterministic uniform(-1/sqrt(H), 1/sqrt(H)) init, PyTorch layouts."""
    stdv = 1.0 / math.sqrt(hidden)
    shapes = {
        'Wd': (hidden, 2 * hidden),
        'Ud': (hidden, hidden),
        'vd': (1, hidden),
        'Wo': (1, hidden + 1),
        'bo': (1,),
        'conv_w': (num_filter, 1, kernel_size),
        'conv_b': (num_filter,),
        'W_ih': (4 * hidden, 1),
        'W_hh': (4 * hidden, hidden),
        'b_ih': (4 * hidden,),
        'b_hh': (4 * hidden,),
        'Wc': (hidden, num_filter * 2 * hidden),
        'bc': (hidden,),
    }
    params = {}
    for name, shape in shapes.items():
        key, sub = jax.random.split(key)
        params[name] = jax.random.uniform(sub, shape, jnp.float32, -stdv, stdv)
    return params


def generator_forward(Z, y_real, params, *, hidden, num_filter, kernel_size,
                      output_len):
    B, W, L = Z.shape
    H = hidden
    F = num_filter
    K = kernel_size
    FL = F * L
    assert L == 2 * hidden
    # TODO(synk): PyTorch 'same' padding is asymmetric for even kernel_size;
    # odd kernel_size assumed here.
    pad = K // 2

    # Fold Conv1d(1, F, K, padding='same') + (F, L)->F*L flatten into a matmul:
    # cm[i, f*L + p] = conv_w[f, 0, i - p + pad]   (zero outside the taps)
    # TODO(synk): at large hidden/num_filter replace this banded (L, F*L)
    # matrix with K shifted adds (pltpu.roll); the VMEM threshold is ~2x lower
    # on v7x (64 MiB physical) than on v5e/v6e.
    taps = params['conv_w'][:, 0, :]                               # (F, K)
    ii = jnp.arange(L)[:, None, None]
    ff = jnp.arange(F)[None, :, None]
    pp = jnp.arange(L)[None, None, :]
    kk = ii - pp + pad
    valid = (kk >= 0) & (kk < K)
    vals = taps[ff, jnp.clip(kk, 0, K - 1)]                        # (L, F, L)
    cm = jnp.where(valid, vals, 0.0).reshape(L, FL)
    cb = jnp.repeat(params['conv_b'], L).reshape(1, FL)
    conv_pack = jnp.concatenate([cm, cb], axis=0).astype(jnp.bfloat16)   # (L+1, FL)

    wc_pack = jnp.concatenate([params['Wc'].T, params['bc'].reshape(1, H)],
                              axis=0).astype(jnp.bfloat16)               # (FL+1, H)

    # ---- single f32 weight slab, lane-padded to 4H columns -------------------
    def gate_blocks(x):   # PyTorch order [i, f, g, o] -> packed order [i, f, o, g]
        return [x[0:H], x[H:2 * H], x[3 * H:4 * H], x[2 * H:3 * H]]

    whh_pack = jnp.concatenate([blk.T for blk in gate_blocks(params['W_hh'])],
                               axis=1)                                    # (H, 4H)
    wih_row = jnp.concatenate(gate_blocks(params['W_ih'][:, 0])).reshape(1, 4 * H)
    bias_row = jnp.concatenate(
        gate_blocks(params['b_ih'] + params['b_hh'])).reshape(1, 4 * H)
    lstm_pack = jnp.concatenate([whh_pack, wih_row, bias_row], axis=0)    # (H+2, 4H)

    slab_w = 4 * H

    def pad_w(x):
        return jnp.pad(x, ((0, 0), (0, slab_w - x.shape[1])))

    vw_row = jnp.concatenate([params['vd'].reshape(1, H),
                              params['Wo'][0, :H].reshape(1, H)], axis=1)  # (1, 2H)
    prev_col = (y_real.reshape(B, 1).astype(jnp.float32) * params['Wo'][0, H]
                + params['bo'][0])                                          # (B, 1)

    slab = jnp.concatenate([
        pad_w(params['Wd'].T),        # rows [0, 2H)      : Wd.T
        pad_w(params['Ud'].T),        # rows [2H, 3H)     : Ud.T
        lstm_pack,                    # rows [3H, 4H+2)   : Whh.T | Wih row | bias row
        pad_w(vw_row),                # row  4H+2         : vd | Wo[:, :H]
        pad_w(prev_col),              # rows [4H+3, 4H+3+B): y_real*Wo[0,H] + bo
    ], axis=0).astype(jnp.float32)                                          # (4H+3+B, 4H)

    z_flat = Z.reshape(B * W, L)

    vmem = pl.BlockSpec(memory_space=pltpu.MemorySpace.VMEM)
    kernel = partial(generator_kernel, batch=B, window=W, hidden=H,
                     output_len=output_len)
    return pl.pallas_call(
        kernel,
        out_shape=jax.ShapeDtypeStruct((B, output_len), jnp.float32),
        in_specs=[vmem, vmem, vmem, vmem],
        out_specs=vmem,
    )(z_flat, conv_pack, wc_pack, slab)


def reference_forward(Z, y_real, params, *, hidden, num_filter, kernel_size,
                      output_len):
    """Plain-JAX (f32, HIGHEST precision) replica of the PyTorch forward."""
    B, W, L = Z.shape
    K = kernel_size
    pad = K // 2
    F = num_filter
    Zp = jnp.pad(Z, ((0, 0), (0, 0), (pad, pad)))
    conv = jnp.zeros((B, W, F, L), jnp.float32)
    for k in range(K):
        conv = conv + params['conv_w'][:, 0, k][None, None, :, None] * \
            Zp[:, :, None, k:k + L]
    conv = conv + params['conv_b'][None, None, :, None]
    Hc = jax.nn.relu(conv).reshape(B, W, F * L)
    H = jax.nn.relu(jnp.matmul(Hc, params['Wc'].T, precision=HI) + params['bc'])
    d = jnp.zeros((B, hidden), jnp.float32)
    s = jnp.zeros((B, hidden), jnp.float32)
    prev_y = y_real.reshape(B, 1)
    preds = []
    for _ in range(output_len):
        d_s = jnp.concatenate([d, s], axis=1)
        e = jnp.tanh(jnp.matmul(d_s, params['Wd'].T, precision=HI)[:, None, :]
                     + jnp.matmul(H, params['Ud'].T, precision=HI))
        l = jnp.einsum('bwh,h->bw', e, params['vd'][0], precision=HI)
        b = jax.nn.softmax(l, axis=-1)
        c = jnp.einsum('bw,bwh->bh', b, H, precision=HI)
        y = jnp.matmul(jnp.concatenate([c, prev_y], axis=1), params['Wo'].T,
                       precision=HI) + params['bo']
        preds.append(y)
        gates = (jnp.matmul(y, params['W_ih'].T, precision=HI) + params['b_ih']
                 + jnp.matmul(d, params['W_hh'].T, precision=HI) + params['b_hh'])
        i_g = jax.nn.sigmoid(gates[:, 0:hidden])
        f_g = jax.nn.sigmoid(gates[:, hidden:2 * hidden])
        g_g = jnp.tanh(gates[:, 2 * hidden:3 * hidden])
        o_g = jax.nn.sigmoid(gates[:, 3 * hidden:4 * hidden])
        s = f_g * s + i_g * g_g
        d = o_g * jnp.tanh(s)
    return jnp.concatenate(preds, axis=1)


if __name__ == "__main__":
    # small config consistent with the module's shape constraints
    hidden = 8           # hidden_size
    num_filter = 4
    kernel_size = 3
    input_len = 8        # window_size W
    output_len = 4
    B = 2

    key = jax.random.PRNGKey(0)
    kp, kz, ky = jax.random.split(key, 3)
    params = init_params(kp, hidden, num_filter, kernel_size)
    Z = jax.random.normal(kz, (B, input_len, 2 * hidden), jnp.float32)
    y_real = jax.random.normal(ky, (B,), jnp.float32)

    out = generator_forward(Z, y_real, params, hidden=hidden,
                            num_filter=num_filter, kernel_size=kernel_size,
                            output_len=output_len)
    out = jax.block_until_ready(out)

    ref = reference_forward(Z, y_real, params, hidden=hidden,
                            num_filter=num_filter, kernel_size=kernel_size,
                            output_len=output_len)
    assert out.shape == (B, output_len)
    # Tolerance reflects bf16 MXU front-end dots, default-precision recurrence
    # dots, the approx-reciprocal softmax and the dropped max-subtraction,
    # compounded through the attention + output_len-step LSTM recurrence;
    # the reference stays f32 / HIGHEST.
    np.testing.assert_allclose(np.asarray(out), np.asarray(ref),
                               rtol=5e-2, atol=5e-2)
    print("KERNEL_OK")
</pallas_src>

<mosaic_0001>
module attributes {stable_mosaic.version = 11 : i64} {
  func.func @generator_kernel(%arg0: memref<16x16xf32, #tpu.memory_space<vmem>>, %arg1: memref<17x64xbf16, #tpu.memory_space<vmem>>, %arg2: memref<65x8xbf16, #tpu.memory_space<vmem>>, %arg3: memref<37x32xf32, #tpu.memory_space<vmem>>, %arg4: memref<2x4xf32, #tpu.memory_space<vmem>>) attributes {dimension_semantics = [], scalar_prefetch = 0 : i64, scratch_operands = 0 : i64, tpu.core_type = #tpu.core_type<tc>} {
    %c0 = arith.constant 0 : index
    %c0_0 = arith.constant 0 : index
    %0 = vector.load %arg0[%c0, %c0_0] : memref<16x16xf32, #tpu.memory_space<vmem>>, vector<16x16xf32>
    %1 = arith.truncf %0 : vector<16x16xf32> to vector<16x16xbf16>
    %c0_1 = arith.constant 0 : index
    %c0_2 = arith.constant 0 : index
    %2 = vector.load %arg1[%c0_1, %c0_2] : memref<17x64xbf16, #tpu.memory_space<vmem>>, vector<17x64xbf16>
    %3 = vector.extract_strided_slice %2 {offsets = [0, 0], sizes = [16, 64], strides = [1, 1]} : vector<17x64xbf16> to vector<16x64xbf16>
    %4 = vector.extract_strided_slice %2 {offsets = [16, 0], sizes = [1, 64], strides = [1, 1]} : vector<17x64xbf16> to vector<1x64xbf16>
    %cst = arith.constant dense<0.000000e+00> : vector<16x64xf32>
    %5 = tpu.matmul %1, %3, %cst {dimension_numbers = #tpu.dot_dimension_numbers<[1], [0], [0], [1], [0, 0, 1, 1], [], []>} : vector<16x16xbf16>, vector<16x64xbf16>, vector<16x64xf32> -> vector<16x64xf32>
    %6 = arith.extf %4 : vector<1x64xbf16> to vector<1x64xf32>
    %7 = vector.broadcast %6 : vector<1x64xf32> to vector<16x64xf32>
    %8 = arith.addf %5, %7 : vector<16x64xf32>
    %cst_3 = arith.constant 0.000000e+00 : f32
    %9 = vector.broadcast %cst_3 : f32 to vector<16x64xf32>
    %10 = arith.maximumf %8, %9 : vector<16x64xf32>
    %c0_4 = arith.constant 0 : index
    %c0_5 = arith.constant 0 : index
    %11 = vector.load %arg2[%c0_4, %c0_5] : memref<65x8xbf16, #tpu.memory_space<vmem>>, vector<65x8xbf16>
    %12 = vector.extract_strided_slice %11 {offsets = [0, 0], sizes = [64, 8], strides = [1, 1]} : vector<65x8xbf16> to vector<64x8xbf16>
    %13 = vector.extract_strided_slice %11 {offsets = [64, 0], sizes = [1, 8], strides = [1, 1]} : vector<65x8xbf16> to vector<1x8xbf16>
    %14 = arith.truncf %10 : vector<16x64xf32> to vector<16x64xbf16>
    %cst_6 = arith.constant dense<0.000000e+00> : vector<16x8xf32>
    %15 = tpu.matmul %14, %12, %cst_6 {dimension_numbers = #tpu.dot_dimension_numbers<[1], [0], [0], [1], [0, 0, 1, 1], [], []>} : vector<16x64xbf16>, vector<64x8xbf16>, vector<16x8xf32> -> vector<16x8xf32>
    %16 = arith.extf %13 : vector<1x8xbf16> to vector<1x8xf32>
    %17 = vector.broadcast %16 : vector<1x8xf32> to vector<16x8xf32>
    %18 = arith.addf %15, %17 : vector<16x8xf32>
    %cst_7 = arith.constant 0.000000e+00 : f32
    %19 = vector.broadcast %cst_7 : f32 to vector<16x8xf32>
    %20 = arith.maximumf %18, %19 : vector<16x8xf32>
    %c0_8 = arith.constant 0 : index
    %c0_9 = arith.constant 0 : index
    %21 = vector.load %arg3[%c0_8, %c0_9] : memref<37x32xf32, #tpu.memory_space<vmem>>, vector<37x32xf32>
    %22 = vector.extract_strided_slice %21 {offsets = [0, 0], sizes = [16, 8], strides = [1, 1]} : vector<37x32xf32> to vector<16x8xf32>
    %23 = vector.extract_strided_slice %21 {offsets = [16, 0], sizes = [8, 8], strides = [1, 1]} : vector<37x32xf32> to vector<8x8xf32>
    %24 = vector.extract_strided_slice %21 {offsets = [24, 0], sizes = [10, 32], strides = [1, 1]} : vector<37x32xf32> to vector<10x32xf32>
    %25 = vector.extract_strided_slice %21 {offsets = [34, 0], sizes = [1, 8], strides = [1, 1]} : vector<37x32xf32> to vector<1x8xf32>
    %26 = vector.extract_strided_slice %21 {offsets = [34, 8], sizes = [1, 8], strides = [1, 1]} : vector<37x32xf32> to vector<1x8xf32>
    %27 = vector.extract_strided_slice %21 {offsets = [35, 0], sizes = [2, 1], strides = [1, 1]} : vector<37x32xf32> to vector<2x1xf32>
    %cst_10 = arith.constant dense<0.000000e+00> : vector<16x8xf32>
    %28 = tpu.matmul %20, %23, %cst_10 {dimension_numbers = #tpu.dot_dimension_numbers<[1], [0], [0], [1], [0, 0, 1, 1], [], []>} : vector<16x8xf32>, vector<8x8xf32>, vector<16x8xf32> -> vector<16x8xf32>
    %29 = vector.shape_cast %20 : vector<16x8xf32> to vector<2x8x8xf32>
    %30 = vector.shape_cast %28 : vector<16x8xf32> to vector<2x8x8xf32>
    %31 = vector.shape_cast %25 : vector<1x8xf32> to vector<1x1x8xf32>
    %cst_11 = arith.constant 1.000000e+00 : f32
    %32 = vector.broadcast %cst_11 : f32 to vector<2x1xf32>
    %cst_12 = arith.constant 0.000000e+00 : f32
    %33 = vector.broadcast %cst_12 : f32 to vector<2x16xf32>
    %34 = vector.extract_strided_slice %33 {offsets = [0, 0], sizes = [2, 8], strides = [1, 1]} : vector<2x16xf32> to vector<2x8xf32>
    %cst_13 = arith.constant dense<0.000000e+00> : vector<2x8xf32>
    %35 = tpu.matmul %33, %22, %cst_13 {dimension_numbers = #tpu.dot_dimension_numbers<[1], [0], [0], [1], [0, 0, 1, 1], [], []>} : vector<2x16xf32>, vector<16x8xf32>, vector<2x8xf32> -> vector<2x8xf32>
    %36 = vector.shape_cast %35 : vector<2x8xf32> to vector<2x1x8xf32>
    %37 = vector.broadcast %36 : vector<2x1x8xf32> to vector<2x8x8xf32>
    %38 = arith.addf %37, %30 : vector<2x8x8xf32>
    %39 = math.tanh %38 : vector<2x8x8xf32>
    %40 = vector.broadcast %31 : vector<1x1x8xf32> to vector<2x8x8xf32>
    %41 = arith.mulf %39, %40 : vector<2x8x8xf32>
    %cst_14 = arith.constant dense<0.000000e+00> : vector<2x8xf32>
    %42 = vector.multi_reduction <add>, %41, %cst_14 [2] : vector<2x8x8xf32> to vector<2x8xf32>
    %43 = vector.shape_cast %42 : vector<2x8xf32> to vector<2x8x1xf32>
    %44 = math.exp %43 : vector<2x8x1xf32>
    %cst_15 = arith.constant dense<0.000000e+00> : vector<2x1xf32>
    %45 = vector.multi_reduction <add>, %44, %cst_15 [1] : vector<2x8x1xf32> to vector<2x1xf32>
    %46 = vector.shape_cast %45 : vector<2x1xf32> to vector<2x1x1xf32>
    %47 = tpu.reciprocal %46 {approx = true} : vector<2x1x1xf32> -> vector<2x1x1xf32>
    %48 = vector.broadcast %47 : vector<2x1x1xf32> to vector<2x8x1xf32>
    %49 = arith.mulf %44, %48 : vector<2x8x1xf32>
    %50 = vector.broadcast %49 : vector<2x8x1xf32> to vector<2x8x8xf32>
    %51 = arith.mulf %50, %29 : vector<2x8x8xf32>
    %cst_16 = arith.constant dense<0.000000e+00> : vector<2x8xf32>
    %52 = vector.multi_reduction <add>, %51, %cst_16 [1] : vector<2x8x8xf32> to vector<2x8xf32>
    %53 = vector.broadcast %26 : vector<1x8xf32> to vector<2x8xf32>
    %54 = arith.mulf %52, %53 : vector<2x8xf32>
    %cst_17 = arith.constant dense<0.000000e+00> : vector<2xf32>
    %55 = vector.multi_reduction <add>, %54, %cst_17 [1] : vector<2x8xf32> to vector<2xf32>
    %56 = vector.shape_cast %55 : vector<2xf32> to vector<2x1xf32>
    %57 = arith.addf %56, %27 : vector<2x1xf32>
    %58 = tpu.concatenate %34, %57, %32 in 1 : vector<2x8xf32>, vector<2x1xf32>, vector<2x1xf32> -> vector<2x10xf32>
    %cst_18 = arith.constant dense<0.000000e+00> : vector<2x32xf32>
    %59 = tpu.matmul %58, %24, %cst_18 {dimension_numbers = #tpu.dot_dimension_numbers<[1], [0], [0], [1], [0, 0, 1, 1], [], []>} : vector<2x10xf32>, vector<10x32xf32>, vector<2x32xf32> -> vector<2x32xf32>
    %60 = vector.extract_strided_slice %59 {offsets = [0, 0], sizes = [2, 24], strides = [1, 1]} : vector<2x32xf32> to vector<2x24xf32>
    %61 = arith.negf %60 : vector<2x24xf32>
    %62 = math.exp %61 : vector<2x24xf32>
    %cst_19 = arith.constant 1.000000e+00 : f32
    %63 = vector.broadcast %cst_19 : f32 to vector<2x24xf32>
    %64 = arith.addf %63, %62 : vector<2x24xf32>
    %65 = arith.divf %63, %64 : vector<2x24xf32>
    %66 = vector.extract_strided_slice %59 {offsets = [0, 24], sizes = [2, 8], strides = [1, 1]} : vector<2x32xf32> to vector<2x8xf32>
    %67 = math.tanh %66 : vector<2x8xf32>
    %68 = vector.extract_strided_slice %65 {offsets = [0, 0], sizes = [2, 8], strides = [1, 1]} : vector<2x24xf32> to vector<2x8xf32>
    %69 = vector.extract_strided_slice %65 {offsets = [0, 8], sizes = [2, 8], strides = [1, 1]} : vector<2x24xf32> to vector<2x8xf32>
    %70 = vector.extract_strided_slice %65 {offsets = [0, 16], sizes = [2, 8], strides = [1, 1]} : vector<2x24xf32> to vector<2x8xf32>
    %71 = vector.extract_strided_slice %33 {offsets = [0, 8], sizes = [2, 8], strides = [1, 1]} : vector<2x16xf32> to vector<2x8xf32>
    %72 = arith.mulf %69, %71 : vector<2x8xf32>
    %73 = arith.mulf %68, %67 : vector<2x8xf32>
    %74 = arith.addf %72, %73 : vector<2x8xf32>
    %75 = math.tanh %74 : vector<2x8xf32>
    %76 = arith.mulf %70, %75 : vector<2x8xf32>
    %77 = tpu.concatenate %76, %74 in 1 : vector<2x8xf32>, vector<2x8xf32> -> vector<2x16xf32>
    %78 = vector.extract_strided_slice %77 {offsets = [0, 0], sizes = [2, 8], strides = [1, 1]} : vector<2x16xf32> to vector<2x8xf32>
    %cst_20 = arith.constant dense<0.000000e+00> : vector<2x8xf32>
    %79 = tpu.matmul %77, %22, %cst_20 {dimension_numbers = #tpu.dot_dimension_numbers<[1], [0], [0], [1], [0, 0, 1, 1], [], []>} : vector<2x16xf32>, vector<16x8xf32>, vector<2x8xf32> -> vector<2x8xf32>
    %80 = vector.shape_cast %79 : vector<2x8xf32> to vector<2x1x8xf32>
    %81 = vector.broadcast %80 : vector<2x1x8xf32> to vector<2x8x8xf32>
    %82 = arith.addf %81, %30 : vector<2x8x8xf32>
    %83 = math.tanh %82 : vector<2x8x8xf32>
    %84 = vector.broadcast %31 : vector<1x1x8xf32> to vector<2x8x8xf32>
    %85 = arith.mulf %83, %84 : vector<2x8x8xf32>
    %cst_21 = arith.constant dense<0.000000e+00> : vector<2x8xf32>
    %86 = vector.multi_reduction <add>, %85, %cst_21 [2] : vector<2x8x8xf32> to vector<2x8xf32>
    %87 = vector.shape_cast %86 : vector<2x8xf32> to vector<2x8x1xf32>
    %88 = math.exp %87 : vector<2x8x1xf32>
    %cst_22 = arith.constant dense<0.000000e+00> : vector<2x1xf32>
    %89 = vector.multi_reduction <add>, %88, %cst_22 [1] : vector<2x8x1xf32> to vector<2x1xf32>
    %90 = vector.shape_cast %89 : vector<2x1xf32> to vector<2x1x1xf32>
    %91 = tpu.reciprocal %90 {approx = true} : vector<2x1x1xf32> -> vector<2x1x1xf32>
    %92 = vector.broadcast %91 : vector<2x1x1xf32> to vector<2x8x1xf32>
    %93 = arith.mulf %88, %92 : vector<2x8x1xf32>
    %94 = vector.broadcast %93 : vector<2x8x1xf32> to vector<2x8x8xf32>
    %95 = arith.mulf %94, %29 : vector<2x8x8xf32>
    %cst_23 = arith.constant dense<0.000000e+00> : vector<2x8xf32>
    %96 = vector.multi_reduction <add>, %95, %cst_23 [1] : vector<2x8x8xf32> to vector<2x8xf32>
    %97 = vector.broadcast %26 : vector<1x8xf32> to vector<2x8xf32>
    %98 = arith.mulf %96, %97 : vector<2x8xf32>
    %cst_24 = arith.constant dense<0.000000e+00> : vector<2xf32>
    %99 = vector.multi_reduction <add>, %98, %cst_24 [1] : vector<2x8xf32> to vector<2xf32>
    %100 = vector.shape_cast %99 : vector<2xf32> to vector<2x1xf32>
    %101 = arith.addf %100, %27 : vector<2x1xf32>
    %102 = tpu.concatenate %78, %101, %32 in 1 : vector<2x8xf32>, vector<2x1xf32>, vector<2x1xf32> -> vector<2x10xf32>
    %cst_25 = arith.constant dense<0.000000e+00> : vector<2x32xf32>
    %103 = tpu.matmul %102, %24, %cst_25 {dimension_numbers = #tpu.dot_dimension_numbers<[1], [0], [0], [1], [0, 0, 1, 1], [], []>} : vector<2x10xf32>, vector<10x32xf32>, vector<2x32xf32> -> vector<2x32xf32>
    %104 = vector.extract_strided_slice %103 {offsets = [0, 0], sizes = [2, 24], strides = [1, 1]} : vector<2x32xf32> to vector<2x24xf32>
    %105 = arith.negf %104 : vector<2x24xf32>
    %106 = math.exp %105 : vector<2x24xf32>
    %cst_26 = arith.constant 1.000000e+00 : f32
    %107 = vector.broadcast %cst_26 : f32 to vector<2x24xf32>
    %108 = arith.addf %107, %106 : vector<2x24xf32>
    %109 = arith.divf %107, %108 : vector<2x24xf32>
    %110 = vector.extract_strided_slice %103 {offsets = [0, 24], sizes = [2, 8], strides = [1, 1]} : vector<2x32xf32> to vector<2x8xf32>
    %111 = math.tanh %110 : vector<2x8xf32>
    %112 = vector.extract_strided_slice %109 {offsets = [0, 0], sizes = [2, 8], strides = [1, 1]} : vector<2x24xf32> to vector<2x8xf32>
    %113 = vector.extract_strided_slice %109 {offsets = [0, 8], sizes = [2, 8], strides = [1, 1]} : vector<2x24xf32> to vector<2x8xf32>
    %114 = vector.extract_strided_slice %109 {offsets = [0, 16], sizes = [2, 8], strides = [1, 1]} : vector<2x24xf32> to vector<2x8xf32>
    %115 = vector.extract_strided_slice %77 {offsets = [0, 8], sizes = [2, 8], strides = [1, 1]} : vector<2x16xf32> to vector<2x8xf32>
    %116 = arith.mulf %113, %115 : vector<2x8xf32>
    %117 = arith.mulf %112, %111 : vector<2x8xf32>
    %118 = arith.addf %116, %117 : vector<2x8xf32>
    %119 = math.tanh %118 : vector<2x8xf32>
    %120 = arith.mulf %114, %119 : vector<2x8xf32>
    %121 = tpu.concatenate %120, %118 in 1 : vector<2x8xf32>, vector<2x8xf32> -> vector<2x16xf32>
    %122 = vector.extract_strided_slice %121 {offsets = [0, 0], sizes = [2, 8], strides = [1, 1]} : vector<2x16xf32> to vector<2x8xf32>
    %cst_27 = arith.constant dense<0.000000e+00> : vector<2x8xf32>
    %123 = tpu.matmul %121, %22, %cst_27 {dimension_numbers = #tpu.dot_dimension_numbers<[1], [0], [0], [1], [0, 0, 1, 1], [], []>} : vector<2x16xf32>, vector<16x8xf32>, vector<2x8xf32> -> vector<2x8xf32>
    %124 = vector.shape_cast %123 : vector<2x8xf32> to vector<2x1x8xf32>
    %125 = vector.broadcast %124 : vector<2x1x8xf32> to vector<2x8x8xf32>
    %126 = arith.addf %125, %30 : vector<2x8x8xf32>
    %127 = math.tanh %126 : vector<2x8x8xf32>
    %128 = vector.broadcast %31 : vector<1x1x8xf32> to vector<2x8x8xf32>
    %129 = arith.mulf %127, %128 : vector<2x8x8xf32>
    %cst_28 = arith.constant dense<0.000000e+00> : vector<2x8xf32>
    %130 = vector.multi_reduction <add>, %129, %cst_28 [2] : vector<2x8x8xf32> to vector<2x8xf32>
    %131 = vector.shape_cast %130 : vector<2x8xf32> to vector<2x8x1xf32>
    %132 = math.exp %131 : vector<2x8x1xf32>
    %cst_29 = arith.constant dense<0.000000e+00> : vector<2x1xf32>
    %133 = vector.multi_reduction <add>, %132, %cst_29 [1] : vector<2x8x1xf32> to vector<2x1xf32>
    %134 = vector.shape_cast %133 : vector<2x1xf32> to vector<2x1x1xf32>
    %135 = tpu.reciprocal %134 {approx = true} : vector<2x1x1xf32> -> vector<2x1x1xf32>
    %136 = vector.broadcast %135 : vector<2x1x1xf32> to vector<2x8x1xf32>
    %137 = arith.mulf %132, %136 : vector<2x8x1xf32>
    %138 = vector.broadcast %137 : vector<2x8x1xf32> to vector<2x8x8xf32>
    %139 = arith.mulf %138, %29 : vector<2x8x8xf32>
    %cst_30 = arith.constant dense<0.000000e+00> : vector<2x8xf32>
    %140 = vector.multi_reduction <add>, %139, %cst_30 [1] : vector<2x8x8xf32> to vector<2x8xf32>
    %141 = vector.broadcast %26 : vector<1x8xf32> to vector<2x8xf32>
    %142 = arith.mulf %140, %141 : vector<2x8xf32>
    %cst_31 = arith.constant dense<0.000000e+00> : vector<2xf32>
    %143 = vector.multi_reduction <add>, %142, %cst_31 [1] : vector<2x8xf32> to vector<2xf32>
    %144 = vector.shape_cast %143 : vector<2xf32> to vector<2x1xf32>
    %145 = arith.addf %144, %27 : vector<2x1xf32>
    %146 = tpu.concatenate %122, %145, %32 in 1 : vector<2x8xf32>, vector<2x1xf32>, vector<2x1xf32> -> vector<2x10xf32>
    %cst_32 = arith.constant dense<0.000000e+00> : vector<2x32xf32>
    %147 = tpu.matmul %146, %24, %cst_32 {dimension_numbers = #tpu.dot_dimension_numbers<[1], [0], [0], [1], [0, 0, 1, 1], [], []>} : vector<2x10xf32>, vector<10x32xf32>, vector<2x32xf32> -> vector<2x32xf32>
    %148 = vector.extract_strided_slice %147 {offsets = [0, 0], sizes = [2, 24], strides = [1, 1]} : vector<2x32xf32> to vector<2x24xf32>
    %149 = arith.negf %148 : vector<2x24xf32>
    %150 = math.exp %149 : vector<2x24xf32>
    %cst_33 = arith.constant 1.000000e+00 : f32
    %151 = vector.broadcast %cst_33 : f32 to vector<2x24xf32>
    %152 = arith.addf %151, %150 : vector<2x24xf32>
    %153 = arith.divf %151, %152 : vector<2x24xf32>
    %154 = vector.extract_strided_slice %147 {offsets = [0, 24], sizes = [2, 8], strides = [1, 1]} : vector<2x32xf32> to vector<2x8xf32>
    %155 = math.tanh %154 : vector<2x8xf32>
    %156 = vector.extract_strided_slice %153 {offsets = [0, 0], sizes = [2, 8], strides = [1, 1]} : vector<2x24xf32> to vector<2x8xf32>
    %157 = vector.extract_strided_slice %153 {offsets = [0, 8], sizes = [2, 8], strides = [1, 1]} : vector<2x24xf32> to vector<2x8xf32>
    %158 = vector.extract_strided_slice %153 {offsets = [0, 16], sizes = [2, 8], strides = [1, 1]} : vector<2x24xf32> to vector<2x8xf32>
    %159 = vector.extract_strided_slice %121 {offsets = [0, 8], sizes = [2, 8], strides = [1, 1]} : vector<2x16xf32> to vector<2x8xf32>
    %160 = arith.mulf %157, %159 : vector<2x8xf32>
    %161 = arith.mulf %156, %155 : vector<2x8xf32>
    %162 = arith.addf %160, %161 : vector<2x8xf32>
    %163 = math.tanh %162 : vector<2x8xf32>
    %164 = arith.mulf %158, %163 : vector<2x8xf32>
    %165 = tpu.concatenate %164, %162 in 1 : vector<2x8xf32>, vector<2x8xf32> -> vector<2x16xf32>
    %cst_34 = arith.constant dense<0.000000e+00> : vector<2x8xf32>
    %166 = tpu.matmul %165, %22, %cst_34 {dimension_numbers = #tpu.dot_dimension_numbers<[1], [0], [0], [1], [0, 0, 1, 1], [], []>} : vector<2x16xf32>, vector<16x8xf32>, vector<2x8xf32> -> vector<2x8xf32>
    %167 = vector.shape_cast %166 : vector<2x8xf32> to vector<2x1x8xf32>
    %168 = vector.broadcast %167 : vector<2x1x8xf32> to vector<2x8x8xf32>
    %169 = arith.addf %168, %30 : vector<2x8x8xf32>
    %170 = math.tanh %169 : vector<2x8x8xf32>
    %171 = vector.broadcast %31 : vector<1x1x8xf32> to vector<2x8x8xf32>
    %172 = arith.mulf %170, %171 : vector<2x8x8xf32>
    %cst_35 = arith.constant dense<0.000000e+00> : vector<2x8xf32>
    %173 = vector.multi_reduction <add>, %172, %cst_35 [2] : vector<2x8x8xf32> to vector<2x8xf32>
    %174 = vector.shape_cast %173 : vector<2x8xf32> to vector<2x8x1xf32>
    %175 = math.exp %174 : vector<2x8x1xf32>
    %cst_36 = arith.constant dense<0.000000e+00> : vector<2x1xf32>
    %176 = vector.multi_reduction <add>, %175, %cst_36 [1] : vector<2x8x1xf32> to vector<2x1xf32>
    %177 = vector.shape_cast %176 : vector<2x1xf32> to vector<2x1x1xf32>
    %178 = tpu.reciprocal %177 {approx = true} : vector<2x1x1xf32> -> vector<2x1x1xf32>
    %179 = vector.broadcast %178 : vector<2x1x1xf32> to vector<2x8x1xf32>
    %180 = arith.mulf %175, %179 : vector<2x8x1xf32>
    %181 = vector.broadcast %180 : vector<2x8x1xf32> to vector<2x8x8xf32>
    %182 = arith.mulf %181, %29 : vector<2x8x8xf32>
    %cst_37 = arith.constant dense<0.000000e+00> : vector<2x8xf32>
    %183 = vector.multi_reduction <add>, %182, %cst_37 [1] : vector<2x8x8xf32> to vector<2x8xf32>
    %184 = vector.broadcast %26 : vector<1x8xf32> to vector<2x8xf32>
    %185 = arith.mulf %183, %184 : vector<2x8xf32>
    %cst_38 = arith.constant dense<0.000000e+00> : vector<2xf32>
    %186 = vector.multi_reduction <add>, %185, %cst_38 [1] : vector<2x8xf32> to vector<2xf32>
    %187 = vector.shape_cast %186 : vector<2xf32> to vector<2x1xf32>
    %188 = arith.addf %187, %27 : vector<2x1xf32>
    %189 = tpu.concatenate %57, %101, %145, %188 in 1 : vector<2x1xf32>, vector<2x1xf32>, vector<2x1xf32>, vector<2x1xf32> -> vector<2x4xf32>
    %c0_39 = arith.constant 0 : index
    %c0_40 = arith.constant 0 : index
    %190 = vector.load %arg4[%c0_39, %c0_40] : memref<2x4xf32, #tpu.memory_space<vmem>>, vector<2x4xf32>
    tpu.vector_store %arg4[%c0_39, %c0_40], %189 {strides = array<i32>} : memref<2x4xf32, #tpu.memory_space<vmem>>, vector<2x4xf32>,
    return
  }
}

</mosaic_0001>

<bundles_post_ra>
// kernel: tpu_custom_call.1
= control target key start
LH: loop header
LB: loop body
LE: loop exit
PB: predicated region body
PF: predicated region fallthrough
CT: control target
= control target key end

     0   :  { %v1552_v1 = vmov 0.0   ;;  %vm1553_vm0 = vmmov 0   ;;  %vm36_vm1 = vcmask 130048   ;;  %s1855_s0 = inlined_call_operand.vmem [shape: f32[16,16], index: 0, kind: input, shape index: {}]   ;;  %s1856_s1 = inlined_call_operand.vmem [shape: bf16[17,64], index: 1, kind: input, shape index: {}]   ;;  %s1857_s2 = inlined_call_operand.vmem [shape: bf16[65,8], index: 2, kind: input, shape index: {}]   ;;  %s1858_s3 = inlined_call_operand.vmem [shape: f32[37,32], index: 3, kind: input, shape index: {}]   ;;  %s1859_s4 = inlined_call_operand.hbm [shape: f32[2,4], index: 4, kind: output, shape index: {}]  }
   0x1   :  { %v1451_v0 = vld [vmem:[%s1856_s1] sm:$0xff]   ;;  %1342 = vmatprep.subr.bf16.mxu0 %v1552_v1  ;;  %v20_v3 = vld [vmem:[%s1855_s0 + $0x8] sm:$0xff]  ;;  %1348 = vmatprep.subr.bf16.mxu1 %v1552_v1 }
   0x2   :  { %v19_v2 = vld [vmem:[%s1855_s0] sm:$0xff]  ;;  %1343 = vmatpush3.bf16.msra.mxu0 %v1451_v0  ;;  %1344 = vmatprep.mubr.msk.bf16.mxu0 %vm1553_vm0, %v1552_v1  ;;  %v1453_v6 = vld [vmem:[%s1857_s2 + $0x8] sm:$0xff]  }
   0x3   :  { %v21_v4 = vpack.c.bf16 %v20_v3, %v19_v2  ;;  %v1452_v5 = vld [vmem:[%s1857_s2] sm:$0xff]   ;;  %1356 = vmatprep.mubr.msk.bf16.mxu1 %vm1553_vm0, %v1552_v1 }
   0x4   :  { %1349 = vmatpush3.bf16.msra.mxu1 %v1452_v5 }
   0x5   :  { %1345 = vmatmul.mubr.msk.bf16.vlgmr.msra.gmra.mrb[0].mxu0 %vm36_vm1, %v21_v4  ;;  %1350 = vmatprep.subr.bf16.mxu1 %v1552_v1 }
   0x6   :  { %9 = vsyncpa [#allocation3], 0  ;;  %v1454_v7 = vld [vmem:[%s1857_s2 + $0x10] sm:$0xff]   ;;  %v1455_v8 = vld [vmem:[%s1857_s2 + $0x18] sm:$0xff]   ;;  %v26_v10 = vlaneseq  ;;  %vm122_vm2 = vcmask 523264   ;;  %v1554_v25 = vmov 0.0|0.0  }
   0x7   :  { %v171_v9 = vld [vmem:[%s1858_s3 + $0x10] sm:$0xff]  ;;  %v24_v12 = vld [vmem:[%s1856_s1 + $0x8] sm:$0x1]  ;;  %v91_v26 = vld [vmem:[%s1857_s2 + $0x20] sm:$0x1]  ;;  %vm174_vm3 = vcmask 64512  }
   0x8   :  { %1351 = vmatpush3.bf16.msra.mxu1 %v1453_v6  ;;  %1360 = vmatprep.subr.mxu0 %v171_v9  ;;  %v27_v11 = vshrl.u32 %v26_v10, 7  ;;  %v25_v13 = vunpack.c.l.bf16 %v24_v12  ;;  %v93_v27 = vunpack.c.l.bf16 %v91_v26  ;;  %v169_v32 = vld [vmem:[%s1858_s3] sm:$0xff]  ;;  %v170_v33 = vld [vmem:[%s1858_s3 + $0x8] sm:$0xff]  ;;  %s1555_s12 = smov 120   ;;  %v1556_v43 = vmov 1966171168  }
   0x9   :  { %1352 = vmatprep.subr.bf16.mxu1 %v1552_v1  ;;  %1361 = vmatpush3.msra.mxu0 %v171_v9  ;;  %v1646_v38 = vpack.c.bf16 %v170_v33, %v169_v32  ;;  %v1664_v41 = vld [vmem:[%s1858_s3 + $0x20] sm:$0x1f]  ;;  %v331_v44 = vunpack.c.l.s4 %v1556_v43  ;;  %vm423_vm4 = vcmask 1041409   ;;  %vm426_vm5 = vcmask 58368   ;;  %s1559_s15 = smov 104   ;;  %s1560_s16 = smov 112  }
   0xa   :  { %v1627_v14 = vsub.s32 0, %v27_v11  ;;  %1414 = vmatprep.subr.bf16.mxu0 %v1554_v25  ;;  %v368_v40 = vsub.s32 2, %v27_v11  ;;  %vm445_vm6 = vcmask 1041408   ;;  %vm1557_vm7 = vmmov 1   ;;  %s1561_s17 = smov 2   ;;  %s1562_s18 = smov 1  }
   0xb   :  { %v332_v45 = vunpack.c.0.s8 %v331_v44  ;;  %vm1703_vm8 = vmpackc.low %vm445_vm6, %vm1557_vm7  ;;  %vm439_vm9 = vcmask 72704   ;;  %vm441_vm10 = vcmask 80896   ;;  %s1563_s19 = smov 3   ;;  %vm1268_vm11 = vcmask 7168   ;;  %s1564_s20 = smov [#allocation2]  }
   0xc   :  { %1353 = vmatpush3.bf16.msra.mxu1 %v1454_v7  ;;  %v29_v15 = vrot.slane %v25_v13, %v1627_v14  ;;  %v97_v28 = vrot.slane %v93_v27, %v1627_v14  ;;  %v1667_v42 = vrot.slane %v1664_v41, %v368_v40  ;;  %vm1270_vm12 = vcmask 15360   ;;  %s1282_s21 = sshll.u32 %s1564_s20, 4  ;;  %s1283_s21 = int_to_ptr.vmem [resolvable:$true] %s1282_s21 }
   0xd   :  { %1354 = vmatprep.subr.bf16.mxu1 %v1552_v1  ;;  %v1672_v47 = vsub.s32 %v332_v45, %v27_v11  ;;  %vm1272_vm13 = vcmask 23552   ;;  %vm1274_vm14 = vcmask 25600   ;;  %s1528_s22 = scalar_lea.vmem %s1283_s21, 32  ;;  %p1533_p1 = scmp.lt.s32.totalorder %s1283_s21, %s1283_s21 }
   0xe   :  { %415 = vrot.lane.b32.xlu1 %v1667_v42, %s1555_s12  ;;  %p1529_p0 = scmp.ne.s32.totalorder %s1283_s21, %s1528_s22  ;;  %p1534_p2 = scmp.lt.s32.totalorder %s1528_s22, %s1528_s22 }
  0x10   :  { %1355 = vmatpush3.bf16.msra.mxu1 %v1455_v8  ;;  %p1535_p3 = por %p1534_p2, %p1533_p1 }
  0x11   :  { %1424 = vmatprep.subr.bf16.mxu1 %v1554_v25 }
  0x12   :  { %p1536_p4 = pnand %p1535_p3, %p1529_p0 }
  0x80   :  { %v1691_v43 = vpop.permute.xlu1 %415 }
  0xd8   :  { %v74_v16 = vpop.f32.mrb[0].mxu0 }
  0xd9   :  { %v75_v17 = vadd.f32 %v74_v16, %v29_v15  ;;  %v1346_v18 = vpop.f32.mrb[1].mxu0 }
  0xda   :  { %v77_v19 = vpop.f32.mrb[2].mxu0 }
  0xdb   :  { %v78_v20 = vadd.f32 %v77_v19, %v29_v15  ;;  %v1347_v21 = vpop.f32.mrb[3].mxu0  ;;  %v81_v22 = vmax.f32 %v75_v17, 0.0 }
  0xdd   :  { %v82_v23 = vmax.f32 %v78_v20, 0.0 }
  0xdf   :  { %v92_v24 = vpack.c.bf16 %v82_v23, %v81_v22 }
  0xe1   :  { %1357 = vmatmul.mubr.msk.bf16.vlgmr.msra.gmra.mrb[0].mxu1 %vm122_vm2, %v92_v24 }
  0xe2   :  { %1390 = vmatprep.mubr.msk.f32.mxu1 %vm1553_vm0, %v1552_v1 }
 0x1b4   :  { %v160_v29 = vpop.f32.mrb[0].mxu1 }
 0x1b5   :  { %v161_v30 = vadd.f32 %v160_v29, %v97_v28  ;;  %v1358_v31 = vpop.f32.mrb[1].mxu1 }
 0x1b6   :  { %v163_v34 = vpop.f32.mrb[2].mxu1 }
 0x1b7   :  { %v1644_v35 = vmax.f32 %v161_v30, 0.0  ;;  %v164_v36 = vadd.f32 %v163_v34, %v97_v28  ;;  %v1359_v37 = vpop.f32.mrb[3].mxu1 }
 0x1b9   :  { %v1648_v39 = vmax.f32 %v164_v36, 0.0  ;;  %1362 = vmatprep.mubr.msk.f32.mxu0 %vm174_vm3, %v1644_v35 }
 0x1bb   :  { %1363 = vmatmul.mubr.msk.f32.vlgmr.msra.gmra.mrb[4].mxu0 %vm174_vm3, %v1648_v39 }
 0x1bc   :  { %1416 = vmatpush3.bf16.msra.mxu0 %v1646_v38  ;;  %1369 = vmatprep.mubr.msk.f32.mxu0 %vm1553_vm0, %v1552_v1 }
 0x1bd   :  { %1417 = vmatprep.subr.bf16.mxu0 %v1554_v25 }
 0x1bf   :  { %1370 = vmatmul.mubr.f32.vlgmr.msra.gmra.mrb[6].mxu0 %v1552_v1 }
 0x1c0   :  { %1376 = vmatprep.mubr.msk.f32.mxu0 %vm1553_vm0, %v1552_v1 }
 0x28e   :  { %v1670_v46 = vpop.f32.mrb[4].mxu0 }
 0x28f   :  { %v1674_v48 = vpop.f32.mrb[5].mxu0 }
 0x292   :  { %v325_v49 = vpop.f32.mrb[6].mxu0 }
 0x293   :  { %v336_v50 = vrot.slane %v325_v49, %v1672_v47  ;;  %v1371_v51 = vpop.f32.mrb[7].mxu0 }
 0x295   :  { %v337_v52 = vcombine.high %v336_v50, %v336_v50  ;;  %v344_v53 = vrot.slane %v336_v50, %v1672_v47 }
 0x297   :  { %v351_v54 = vrot.slane %v337_v52, %v1672_v47  ;;  %v355_v55 = vrot.slane %v344_v53, %v1627_v14 }
 0x299   :  { %v359_v56 = vrot.slane %v351_v54, %v1627_v14  ;;  %v362_v57 = vadd.f32 %v355_v55, %v1674_v48 }
 0x29b   :  { %v363_v58 = vadd.f32 %v1670_v46, %v359_v56  ;;  %1456 = vtanh.f32 %v362_v57  ;;  %v172_v56 = vld [vmem:[%s1858_s3 + $0x18] sm:$0xff]  ;;  %s1558_s3 = smov 8  }
 0x29c   :  { %v1701_v57 = vpack.c.bf16 %v1664_v41, %v172_v56 }
 0x29d   :  { %1458 = vtanh.f32 %v363_v58 }
 0x29e   :  { %1420 = vmatpush3.bf16.msk.msra.mxu0 %vm1703_vm8, %v1701_v57  ;;  %1427 = vmatpush3.bf16.msk.msra.mxu1 %vm1703_vm8, %v1701_v57 }
 0x29f   :  { %1421 = vmatprep.subr.bf16.mxu0 %v1554_v25  ;;  %1431 = vmatprep.subr.bf16.mxu1 %v1554_v25 }
 0x2a5   :  { %v1457_v59 = vpop.eup %1456 }
 0x2a6   :  { %v370_v63 = vmul.f32 %v1457_v59, %v1667_v42  ;;  %v1716_v59 = vrot.slane %v1664_v41, 3 }
 0x2a7   :  { %v1459_v60 = vpop.eup %1458 }
 0x2a8   :  { %v371_v61 = vmul.f32 %v1459_v60, %v1667_v42  ;;  %v372_v0 = vsel %vm174_vm3, %v370_v63, 0.0 }
 0x2aa   :  { %v375_v62 = vsel %vm174_vm3, %v371_v61, 0.0 }
 0x2ab   :  { %376 = vadd.xlane.f32.xlu0 %v375_v62 }
 0x2af   :  { %373 = vadd.xlane.f32.xlu0 %v372_v0 }
 0x338   :  { %v377_v2 = vpop.xlane.xlu0 %376 }
 0x339   :  { %v380_v3 = vmul.f32 1.442695, %v377_v2 }
 0x33b   :  { %1460 = vpow2.f32 %v380_v3 }
 0x33c   :  { %v374_v4 = vpop.xlane.xlu0 %373 }
 0x33d   :  { %v378_v5 = vmul.f32 1.442695, %v374_v4 }
 0x33f   :  { %1462 = vpow2.f32 %v378_v5 }
 0x345   :  { %v1461_v6 = vpop.eup %1460 }
 0x346   :  { %v388_v7 = vrot.slane %v1461_v6, 4 }
 0x348   :  { %v389_v8 = vadd.f32 %v1461_v6, %v388_v7 }
 0x349   :  { %v1463_v9 = vpop.eup %1462 }
 0x34a   :  { %v390_v10 = vrot.slane %v389_v8, 2  ;;  %v382_v11 = vrot.slane %v1463_v9, 4 }
 0x34c   :  { %v391_v12 = vadd.f32 %v390_v10, %v389_v8  ;;  %v383_v13 = vadd.f32 %v1463_v9, %v382_v11 }
 0x34e   :  { %v392_v15 = vrot.slane %v391_v12, 1  ;;  %v384_v16 = vrot.slane %v383_v13, 2 }
 0x350   :  { %v385_v17 = vadd.f32 %v384_v16, %v383_v13  ;;  %v393_v18 = vadd.f32 %v392_v15, %v391_v12 }
 0x352   :  { %v386_v19 = vrot.slane %v385_v17, 1  ;;  %1464 = vrcp.f32 %v393_v18 }
 0x354   :  { %v387_v20 = vadd.f32 %v386_v19, %v385_v17 }
 0x356   :  { %1466 = vrcp.f32 %v387_v20 }
 0x35c   :  { %v1465_v21 = vpop.eup %1464 }
 0x35d   :  { %v397_v22 = vmul.f32 %v1465_v21, %v1461_v6 }
 0x35f   :  { %v399_v23 = vmul.f32 %v397_v22, %v1648_v39 }
 0x360   :  { %v1467_v24 = vpop.eup %1466 }
 0x361   :  { %v396_v26 = vmul.f32 %v1467_v24, %v1463_v9  ;;  %v407_v27 = vsel %vm174_vm3, %v399_v23, 0.0 }
 0x362   :  { %v408_v28 = vrot.slane %v407_v27, 4 }
 0x363   :  { %v398_v29 = vmul.f32 %v396_v26, %v1644_v35 }
 0x364   :  { %v409_v30 = vadd.f32 %v408_v28, %v407_v27 }
 0x365   :  { %v400_v31 = vsel %vm174_vm3, %v398_v29, 0.0 }
 0x366   :  { %v401_v32 = vrot.slane %v400_v31, 4  ;;  %v410_v33 = vrot.slane %v409_v30, 2 }
 0x368   :  { %v402_v34 = vadd.f32 %v401_v32, %v400_v31  ;;  %v411_v36 = vadd.f32 %v410_v33, %v409_v30 }
 0x36a   :  { %v403_v37 = vrot.slane %v402_v34, 2  ;;  %v412_v40 = vrot.slane %v411_v36, 1 }
 0x36c   :  { %v404_v44 = vadd.f32 %v403_v37, %v402_v34  ;;  %v413_v45 = vadd.f32 %v412_v40, %v411_v36 }
 0x36e   :  { %v405_v49 = vrot.slane %v404_v44, 1  ;;  %v419_v50 = vmul.f32 %v1691_v43, %v413_v45 }
 0x370   :  { %v406_v51 = vadd.f32 %v405_v49, %v404_v44  ;;  %v422_v53 = vrot.slane %v419_v50, 7 }
 0x372   :  { %v418_v52 = vmul.f32 %v1691_v43, %v406_v51 }
 0x374   :  { %v424_v54 = vsel %vm423_vm4, %v422_v53, %v418_v52 }
 0x375   :  { %v427_v55 = vsel %vm426_vm5, %v424_v54, 0.0 }
 0x376   :  { %428 = vadd.xlane.f32.xlu1 %v427_v55 }
 0x403   :  { %v429_v60 = vpop.xlane.xlu1 %428 }
 0x404   :  { %v1719_v61 = vadd.f32 %v1716_v59, %v429_v60 }
 0x406   :  { %435 = vrot.lane.b32.xlu0 %v1719_v61, %s1558_s3 }
 0x478   :  { %v436_v62 = vpop.permute.xlu0 %435 }
 0x479   :  { %v438_v63 = vsel %vm174_vm3, 0.0, %v436_v62 }
 0x47a   :  { %v440_v0 = vsel %vm439_vm9, %v438_v63, 1.0 }
 0x47b   :  { %1377 = vmatmul.mubr.msk.f32.vlgmr.msra.gmra.mrb[8].mxu0 %vm441_vm10, %v440_v0 }
 0x47c   :  { %1423 = vmatpush3.bf16.msra.mxu0 %v1646_v38  ;;  %1383 = vmatprep.mubr.msk.f32.mxu0 %vm1553_vm0, %v1552_v1 }
 0x47d   :  { %1428 = vmatprep.subr.bf16.mxu0 %v1554_v25 }
 0x54e   :  { %v514_v41 = vpop.f32.mrb[8].mxu0 }
 0x54f   :  { %1468 = vtanh.f32 %v514_v41  ;;  %v1378_v2 = vpop.f32.mrb[9].mxu0  ;;  %v1301_v4 = vmul.f32 -1.442695, %v514_v41 }
 0x551   :  { %1470 = vpow2.f32 %v1301_v4 }
 0x559   :  { %v1469_v3 = vpop.eup %1468 }
 0x55a   :  { %527 = vrot.lane.b32.xlu0 %v1469_v3, %s1559_s15 }
 0x55b   :  { %v1471_v5 = vpop.eup %1470 }
 0x55c   :  { %v521_v6 = vadd.f32 1.0, %v1471_v5 }
 0x55e   :  { %1472 = vrcp.f32 %v521_v6 }
 0x568   :  { %v1473_v7 = vpop.eup %1472 }
 0x569   :  { %v525_v10 = vmul.f32 0.0, %v1473_v7 }
 0x5cc   :  { %v528_v8 = vpop.permute.xlu0 %527 }
 0x5cd   :  { %v530_v9 = vmul.f32 %v1473_v7, %v528_v8 }
 0x5cf   :  { %532 = vrot.lane.b32.xlu0 %v530_v9, %s1558_s3 }
 0x641   :  { %v533_v11 = vpop.permute.xlu0 %532 }
 0x642   :  { %v535_v12 = vadd.f32 %v533_v11, %v525_v10 }
 0x644   :  { %1474 = vtanh.f32 %v535_v12 }
 0x64e   :  { %v1475_v13 = vpop.eup %1474 }
 0x64f   :  { %538 = vrot.lane.b32.xlu0 %v1475_v13, %s1558_s3 }
 0x6c1   :  { %v539_v15 = vpop.permute.xlu0 %538 }
 0x6c2   :  { %v541_v16 = vmul.f32 %v1473_v7, %v539_v15 }
 0x6c4   :  { %543 = vrot.lane.b32.xlu1 %v541_v16, %s1560_s16 }
 0x736   :  { %v544_v17 = vpop.permute.xlu1 %543 }
 0x737   :  { %v1735_v18 = vsel %vm174_vm3, %v544_v17, %v535_v12 }
 0x738   :  { %1384 = vmatmul.mubr.msk.f32.vlgmr.msra.gmra.mrb[10].mxu0 %vm36_vm1, %v1735_v18 }
 0x739   :  { %1430 = vmatpush3.bf16.msra.mxu0 %v1646_v38  ;;  %1397 = vmatprep.mubr.msk.f32.mxu0 %vm1553_vm0, %v1552_v1 }
 0x73a   :  { %1435 = vmatprep.subr.bf16.mxu0 %v1554_v25 }
 0x80b   :  { %v616_v19 = vpop.f32.mrb[10].mxu0 }
 0x80c   :  { %v627_v20 = vrot.slane %v616_v19, %v1672_v47  ;;  %v1385_v21 = vpop.f32.mrb[11].mxu0 }
 0x80e   :  { %v628_v22 = vcombine.high %v627_v20, %v627_v20  ;;  %v635_v23 = vrot.slane %v627_v20, %v1672_v47 }
 0x810   :  { %v642_v24 = vrot.slane %v628_v22, %v1672_v47  ;;  %v646_v26 = vrot.slane %v635_v23, %v1627_v14 }
 0x812   :  { %v650_v27 = vrot.slane %v642_v24, %v1627_v14  ;;  %v653_v28 = vadd.f32 %v646_v26, %v1674_v48 }
 0x814   :  { %v654_v29 = vadd.f32 %v1670_v46, %v650_v27  ;;  %1476 = vtanh.f32 %v653_v28 }
 0x816   :  { %1478 = vtanh.f32 %v654_v29 }
 0x81e   :  { %v1477_v25 = vpop.eup %1476 }
 0x81f   :  { %v657_v30 = vmul.f32 %v1477_v25, %v1667_v42 }
 0x820   :  { %v1479_v31 = vpop.eup %1478 }
 0x821   :  { %v659_v32 = vsel %vm174_vm3, %v657_v30, 0.0  ;;  %v658_v33 = vmul.f32 %v1479_v31, %v1667_v42 }
 0x822   :  { %660 = vadd.xlane.f32.xlu1 %v659_v32 }
 0x823   :  { %v662_v34 = vsel %vm174_vm3, %v658_v33, 0.0 }
 0x824   :  { %663 = vadd.xlane.f32.xlu0 %v662_v34 }
 0x8af   :  { %v661_v36 = vpop.xlane.xlu1 %660 }
 0x8b0   :  { %v665_v37 = vmul.f32 1.442695, %v661_v36 }
 0x8b1   :  { %v664_v40 = vpop.xlane.xlu0 %663 }
 0x8b2   :  { %1480 = vpow2.f32 %v665_v37  ;;  %v667_v44 = vmul.f32 1.442695, %v664_v40 }
 0x8b4   :  { %1482 = vpow2.f32 %v667_v44 }
 0x8bc   :  { %v1481_v45 = vpop.eup %1480 }
 0x8bd   :  { %v669_v49 = vrot.slane %v1481_v45, 4 }
 0x8be   :  { %v1483_v50 = vpop.eup %1482 }
 0x8bf   :  { %v670_v51 = vadd.f32 %v1481_v45, %v669_v49  ;;  %v675_v52 = vrot.slane %v1483_v50, 4 }
 0x8c1   :  { %v671_v53 = vrot.slane %v670_v51, 2  ;;  %v676_v54 = vadd.f32 %v1483_v50, %v675_v52 }
 0x8c3   :  { %v672_v55 = vadd.f32 %v671_v53, %v670_v51  ;;  %v677_v56 = vrot.slane %v676_v54, 2 }
 0x8c5   :  { %v673_v60 = vrot.slane %v672_v55, 1  ;;  %v678_v62 = vadd.f32 %v677_v56, %v676_v54 }
 0x8c7   :  { %v679_v63 = vrot.slane %v678_v62, 1  ;;  %v674_v0 = vadd.f32 %v673_v60, %v672_v55 }
 0x8c9   :  { %v680_v41 = vadd.f32 %v679_v63, %v678_v62  ;;  %1484 = vrcp.f32 %v674_v0 }
 0x8cb   :  { %1486 = vrcp.f32 %v680_v41 }
 0x8d3   :  { %v1485_v2 = vpop.eup %1484 }
 0x8d4   :  { %v683_v3 = vmul.f32 %v1485_v2, %v1481_v45 }
 0x8d5   :  { %v1487_v4 = vpop.eup %1486 }
 0x8d6   :  { %v684_v5 = vmul.f32 %v1487_v4, %v1483_v50  ;;  %v685_v6 = vmul.f32 %v683_v3, %v1644_v35 }
 0x8d8   :  { %v686_v7 = vmul.f32 %v684_v5, %v1648_v39  ;;  %v687_v8 = vsel %vm174_vm3, %v685_v6, 0.0 }
 0x8d9   :  { %v688_v9 = vrot.slane %v687_v8, 4 }
 0x8da   :  { %v694_v10 = vsel %vm174_vm3, %v686_v7, 0.0 }
 0x8db   :  { %v689_v11 = vadd.f32 %v688_v9, %v687_v8  ;;  %v695_v12 = vrot.slane %v694_v10, 4 }
 0x8dd   :  { %v690_v13 = vrot.slane %v689_v11, 2  ;;  %v696_v15 = vadd.f32 %v695_v12, %v694_v10 }
 0x8df   :  { %v691_v16 = vadd.f32 %v690_v13, %v689_v11  ;;  %v697_v17 = vrot.slane %v696_v15, 2 }
 0x8e1   :  { %v692_v19 = vrot.slane %v691_v16, 1  ;;  %v698_v20 = vadd.f32 %v697_v17, %v696_v15 }
 0x8e3   :  { %v699_v21 = vrot.slane %v698_v20, 1  ;;  %v693_v22 = vadd.f32 %v692_v19, %v691_v16 }
 0x8e5   :  { %v700_v23 = vadd.f32 %v699_v21, %v698_v20  ;;  %v701_v26 = vmul.f32 %v693_v22, %v1691_v43 }
 0x8e7   :  { %v702_v24 = vmul.f32 %v700_v23, %v1691_v43 }
 0x8e9   :  { %v705_v27 = vrot.slane %v702_v24, 7 }
 0x8eb   :  { %v706_v28 = vsel %vm423_vm4, %v705_v27, %v701_v26 }
 0x8ec   :  { %v708_v29 = vsel %vm426_vm5, %v706_v28, 0.0 }
 0x8ed   :  { %709 = vadd.xlane.f32.xlu0 %v708_v29 }
 0x97a   :  { %v710_v25 = vpop.xlane.xlu0 %709 }
 0x97b   :  { %v1763_v30 = vadd.f32 %v710_v25, %v1716_v59 }
 0x97d   :  { %713 = vrot.lane.b32.xlu0 %v1763_v30, %s1558_s3 }
 0x9ef   :  { %v714_v31 = vpop.permute.xlu0 %713 }
 0x9f0   :  { %v716_v32 = vsel %vm174_vm3, %v1735_v18, %v714_v31 }
 0x9f1   :  { %v717_v33 = vsel %vm439_vm9, %v716_v32, 1.0 }
 0x9f2   :  { %1391 = vmatmul.mubr.msk.f32.vlgmr.msra.gmra.mrb[4].mxu1 %vm441_vm10, %v717_v33 }
 0x9f3   :  { %1434 = vmatpush3.bf16.msk.msra.mxu1 %vm1703_vm8, %v1701_v57  ;;  %1404 = vmatprep.mubr.msk.f32.mxu1 %vm1553_vm0, %v1552_v1 }
 0xac5   :  { %v787_v34 = vpop.f32.mrb[4].mxu1 }
 0xac6   :  { %1488 = vtanh.f32 %v787_v34  ;;  %v1392_v36 = vpop.f32.mrb[5].mxu1  ;;  %v1305_v40 = vmul.f32 -1.442695, %v787_v34 }
 0xac8   :  { %1490 = vpow2.f32 %v1305_v40 }
 0xad0   :  { %v1489_v37 = vpop.eup %1488 }
 0xad1   :  { %800 = vrot.lane.b32.xlu1 %v1489_v37, %s1559_s15 }
 0xad2   :  { %v1491_v44 = vpop.eup %1490 }
 0xad3   :  { %v794_v45 = vadd.f32 1.0, %v1491_v44 }
 0xad5   :  { %1492 = vrcp.f32 %v794_v45 }
 0xadf   :  { %v1493_v49 = vpop.eup %1492 }
 0xae0   :  { %v798_v57 = vmul.f32 %v1493_v49, %v1735_v18 }
 0xb43   :  { %v801_v50 = vpop.permute.xlu1 %800 }
 0xb44   :  { %v803_v51 = vmul.f32 %v1493_v49, %v801_v50 }
 0xb46   :  { %805 = vrot.lane.b32.xlu0 %v803_v51, %s1558_s3 }
 0xbb8   :  { %v806_v58 = vpop.permute.xlu0 %805 }
 0xbb9   :  { %v808_v52 = vadd.f32 %v806_v58, %v798_v57 }
 0xbbb   :  { %1494 = vtanh.f32 %v808_v52 }
 0xbc5   :  { %v1495_v53 = vpop.eup %1494 }
 0xbc6   :  { %811 = vrot.lane.b32.xlu0 %v1495_v53, %s1558_s3 }
 0xc38   :  { %v812_v54 = vpop.permute.xlu0 %811 }
 0xc39   :  { %v814_v55 = vmul.f32 %v1493_v49, %v812_v54 }
 0xc3b   :  { %816 = vrot.lane.b32.xlu0 %v814_v55, %s1560_s16 }
 0xcad   :  { %v817_v56 = vpop.permute.xlu0 %816 }
 0xcae   :  { %v1782_v60 = vsel %vm174_vm3, %v817_v56, %v808_v52 }
 0xcaf   :  { %1398 = vmatmul.mubr.msk.f32.vlgmr.msra.gmra.mrb[12].mxu0 %vm36_vm1, %v1782_v60 }
 0xcb0   :  { %1437 = vmatpush3.bf16.msra.mxu0 %v1646_v38  ;;  %1411 = vmatprep.mubr.msk.f32.mxu0 %vm1553_vm0, %v1552_v1 }
 0xd82   :  { %v889_v18 = vpop.f32.mrb[12].mxu0 }
 0xd83   :  { %v900_v62 = vrot.slane %v889_v18, %v1672_v47  ;;  %v1399_v63 = vpop.f32.mrb[13].mxu0 }
 0xd85   :  { %v901_v0 = vcombine.high %v900_v62, %v900_v62  ;;  %v908_v41 = vrot.slane %v900_v62, %v1672_v47 }
 0xd87   :  { %v915_v2 = vrot.slane %v901_v0, %v1672_v47  ;;  %v919_v3 = vrot.slane %v908_v41, %v1627_v14 }
 0xd89   :  { %v923_v4 = vrot.slane %v915_v2, %v1627_v14  ;;  %v926_v5 = vadd.f32 %v919_v3, %v1674_v48 }
 0xd8b   :  { %v927_v38 = vadd.f32 %v1670_v46, %v923_v4  ;;  %1496 = vtanh.f32 %v926_v5 }
 0xd8d   :  { %1498 = vtanh.f32 %v927_v38 }
 0xd95   :  { %v1497_v1 = vpop.eup %1496 }
 0xd96   :  { %v930_v6 = vmul.f32 %v1497_v1, %v1667_v42 }
 0xd97   :  { %v1499_v7 = vpop.eup %1498 }
 0xd98   :  { %v932_v8 = vsel %vm174_vm3, %v930_v6, 0.0  ;;  %v931_v9 = vmul.f32 %v1499_v7, %v1667_v42 }
 0xd99   :  { %933 = vadd.xlane.f32.xlu0 %v932_v8 }
 0xd9a   :  { %v935_v10 = vsel %vm174_vm3, %v931_v9, 0.0 }
 0xd9b   :  { %936 = vadd.xlane.f32.xlu1 %v935_v10 }
 0xe26   :  { %v934_v11 = vpop.xlane.xlu0 %933 }
 0xe27   :  { %v938_v12 = vmul.f32 1.442695, %v934_v11 }
 0xe28   :  { %v937_v13 = vpop.xlane.xlu1 %936 }
 0xe29   :  { %1500 = vpow2.f32 %v938_v12  ;;  %v940_v15 = vmul.f32 1.442695, %v937_v13 }
 0xe2b   :  { %1502 = vpow2.f32 %v940_v15 }
 0xe33   :  { %v1501_v16 = vpop.eup %1500 }
 0xe34   :  { %v942_v17 = vrot.slane %v1501_v16, 4 }
 0xe35   :  { %v1503_v19 = vpop.eup %1502 }
 0xe36   :  { %v943_v20 = vadd.f32 %v1501_v16, %v942_v17  ;;  %v948_v21 = vrot.slane %v1503_v19, 4 }
 0xe38   :  { %v944_v22 = vrot.slane %v943_v20, 2  ;;  %v949_v23 = vadd.f32 %v1503_v19, %v948_v21 }
 0xe3a   :  { %v945_v24 = vadd.f32 %v944_v22, %v943_v20  ;;  %v950_v26 = vrot.slane %v949_v23, 2 }
 0xe3c   :  { %v946_v27 = vrot.slane %v945_v24, 1  ;;  %v951_v28 = vadd.f32 %v950_v26, %v949_v23 }
 0xe3e   :  { %v952_v29 = vrot.slane %v951_v28, 1  ;;  %v947_v25 = vadd.f32 %v946_v27, %v945_v24 }
 0xe40   :  { %v953_v31 = vadd.f32 %v952_v29, %v951_v28  ;;  %1504 = vrcp.f32 %v947_v25 }
 0xe42   :  { %1506 = vrcp.f32 %v953_v31 }
 0xe4a   :  { %v1505_v32 = vpop.eup %1504 }
 0xe4b   :  { %v956_v33 = vmul.f32 %v1505_v32, %v1501_v16 }
 0xe4c   :  { %v1507_v34 = vpop.eup %1506 }
 0xe4d   :  { %v957_v36 = vmul.f32 %v1507_v34, %v1503_v19  ;;  %v958_v37 = vmul.f32 %v956_v33, %v1644_v35 }
 0xe4f   :  { %v959_v40 = vmul.f32 %v957_v36, %v1648_v39  ;;  %v960_v44 = vsel %vm174_vm3, %v958_v37, 0.0 }
 0xe50   :  { %v961_v45 = vrot.slane %v960_v44, 4 }
 0xe51   :  { %v967_v49 = vsel %vm174_vm3, %v959_v40, 0.0 }
 0xe52   :  { %v962_v50 = vadd.f32 %v961_v45, %v960_v44  ;;  %v968_v51 = vrot.slane %v967_v49, 4 }
 0xe54   :  { %v963_v57 = vrot.slane %v962_v50, 2  ;;  %v969_v58 = vadd.f32 %v968_v51, %v967_v49 }
 0xe56   :  { %v964_v52 = vadd.f32 %v963_v57, %v962_v50  ;;  %v970_v53 = vrot.slane %v969_v58, 2 }
 0xe58   :  { %v965_v54 = vrot.slane %v964_v52, 1  ;;  %v971_v55 = vadd.f32 %v970_v53, %v969_v58 }
 0xe5a   :  { %v972_v56 = vrot.slane %v971_v55, 1  ;;  %v966_v18 = vadd.f32 %v965_v54, %v964_v52 }
 0xe5c   :  { %v973_v62 = vadd.f32 %v972_v56, %v971_v55  ;;  %v974_v0 = vmul.f32 %v966_v18, %v1691_v43 }
 0xe5e   :  { %v975_v63 = vmul.f32 %v973_v62, %v1691_v43 }
 0xe60   :  { %v978_v41 = vrot.slane %v975_v63, 7 }
 0xe62   :  { %v979_v2 = vsel %vm423_vm4, %v978_v41, %v974_v0 }
 0xe63   :  { %v981_v3 = vsel %vm426_vm5, %v979_v2, 0.0 }
 0xe64   :  { %982 = vadd.xlane.f32.xlu0 %v981_v3 }
 0xef1   :  { %v983_v4 = vpop.xlane.xlu0 %982 }
 0xef2   :  { %v984_v5 = vadd.f32 %v983_v4, %v1716_v59 }
 0xef4   :  { %986 = vrot.lane.b32.xlu0 %v984_v5, %s1558_s3 }
 0xf66   :  { %v987_v38 = vpop.permute.xlu0 %986 }
 0xf67   :  { %v989_v1 = vsel %vm174_vm3, %v1782_v60, %v987_v38 }
 0xf68   :  { %v990_v6 = vsel %vm439_vm9, %v989_v1, 1.0 }
 0xf69   :  { %1405 = vmatmul.mubr.msk.f32.vlgmr.msra.gmra.mrb[6].mxu1 %vm441_vm10, %v990_v6 }
0x103c   :  { %v1060_v7 = vpop.f32.mrb[6].mxu1 }
0x103d   :  { %1508 = vtanh.f32 %v1060_v7  ;;  %v1406_v8 = vpop.f32.mrb[7].mxu1  ;;  %v1309_v10 = vmul.f32 -1.442695, %v1060_v7 }
0x103f   :  { %1510 = vpow2.f32 %v1309_v10 }
0x1047   :  { %v1509_v9 = vpop.eup %1508 }
0x1048   :  { %1073 = vrot.lane.b32.xlu1 %v1509_v9, %s1559_s15 }
0x1049   :  { %v1511_v11 = vpop.eup %1510 }
0x104a   :  { %v1067_v12 = vadd.f32 1.0, %v1511_v11 }
0x104c   :  { %1512 = vrcp.f32 %v1067_v12 }
0x1056   :  { %v1513_v13 = vpop.eup %1512 }
0x1057   :  { %v1071_v17 = vmul.f32 %v1513_v13, %v1782_v60 }
0x10ba   :  { %v1074_v15 = vpop.permute.xlu1 %1073 }
0x10bb   :  { %v1076_v16 = vmul.f32 %v1513_v13, %v1074_v15 }
0x10bd   :  { %1078 = vrot.lane.b32.xlu1 %v1076_v16, %s1558_s3 }
0x112f   :  { %v1079_v19 = vpop.permute.xlu1 %1078 }
0x1130   :  { %v1081_v20 = vadd.f32 %v1079_v19, %v1071_v17 }
0x1132   :  { %1514 = vtanh.f32 %v1081_v20 }
0x113c   :  { %v1515_v21 = vpop.eup %1514 }
0x113d   :  { %1084 = vrot.lane.b32.xlu1 %v1515_v21, %s1558_s3 }
0x11af   :  { %v1085_v22 = vpop.permute.xlu1 %1084 }
0x11b0   :  { %v1087_v23 = vmul.f32 %v1513_v13, %v1085_v22 }
0x11b2   :  { %1089 = vrot.lane.b32.xlu0 %v1087_v23, %s1560_s16 }
0x1224   :  { %v1090_v24 = vpop.permute.xlu0 %1089 }
0x1225   :  { %v1092_v26 = vsel %vm174_vm3, %v1090_v24, %v1081_v20 }
0x1226   :  { %1412 = vmatmul.mubr.msk.f32.vlgmr.msra.gmra.mrb[14].mxu0 %vm36_vm1, %v1092_v26 }
0x12f9   :  { %v1162_v27 = vpop.f32.mrb[14].mxu0 }
0x12fa   :  { %v1173_v28 = vrot.slane %v1162_v27, %v1672_v47  ;;  %v1413_v29 = vpop.f32.mrb[15].mxu0 }
0x12fc   :  { %v1174_v60 = vcombine.high %v1173_v28, %v1173_v28  ;;  %v1181_v25 = vrot.slane %v1173_v28, %v1672_v47 }
0x12fe   :  { %v1188_v31 = vrot.slane %v1174_v60, %v1672_v47  ;;  %v1192_v32 = vrot.slane %v1181_v25, %v1627_v14 }
0x1300   :  { %v1196_v33 = vrot.slane %v1188_v31, %v1627_v14  ;;  %v1199_v34 = vadd.f32 %v1192_v32, %v1674_v48 }
0x1302   :  { %v1200_v36 = vadd.f32 %v1670_v46, %v1196_v33  ;;  %1516 = vtanh.f32 %v1199_v34 }
0x1304   :  { %1518 = vtanh.f32 %v1200_v36 }
0x130c   :  { %v1517_v37 = vpop.eup %1516 }
0x130d   :  { %v1203_v40 = vmul.f32 %v1517_v37, %v1667_v42 }
0x130e   :  { %v1519_v44 = vpop.eup %1518 }
0x130f   :  { %v1205_v45 = vsel %vm174_vm3, %v1203_v40, 0.0  ;;  %v1204_v49 = vmul.f32 %v1519_v44, %v1667_v42 }
0x1310   :  { %1206 = vadd.xlane.f32.xlu0 %v1205_v45 }
0x1311   :  { %v1208_v47 = vsel %vm174_vm3, %v1204_v49, 0.0 }
0x1312   :  { %1209 = vadd.xlane.f32.xlu1 %v1208_v47 }
0x1323   :  { %1261 = vrot.lane.b32.xlu1 %v984_v5, %s1561_s17 }
0x139d   :  { %v1207_v14 = vpop.xlane.xlu0 %1206 }
0x139e   :  { %v1211_v48 = vmul.f32 1.442695, %v1207_v14 }
0x139f   :  { %v1210_v50 = vpop.xlane.xlu1 %1209 }
0x13a0   :  { %1520 = vpow2.f32 %v1211_v48  ;;  %v1213_v46 = vmul.f32 1.442695, %v1210_v50 }
0x13a2   :  { %1522 = vpow2.f32 %v1213_v46 }
0x13a3   :  { %v1262_v29 = vpop.permute.xlu1 %1261 }
0x13aa   :  { %v1521_v51 = vpop.eup %1520 }
0x13ab   :  { %v1215_v57 = vrot.slane %v1521_v51, 4 }
0x13ac   :  { %v1523_v58 = vpop.eup %1522 }
0x13ad   :  { %v1216_v52 = vadd.f32 %v1521_v51, %v1215_v57  ;;  %v1221_v53 = vrot.slane %v1523_v58, 4 }
0x13af   :  { %v1217_v54 = vrot.slane %v1216_v52, 2  ;;  %v1222_v55 = vadd.f32 %v1523_v58, %v1221_v53 }
0x13b1   :  { %v1218_v42 = vadd.f32 %v1217_v54, %v1216_v52  ;;  %v1223_v56 = vrot.slane %v1222_v55, 2 }
0x13b3   :  { %v1219_v18 = vrot.slane %v1218_v42, 1  ;;  %v1224_v62 = vadd.f32 %v1223_v56, %v1222_v55 }
0x13b5   :  { %v1225_v63 = vrot.slane %v1224_v62, 1  ;;  %v1220_v0 = vadd.f32 %v1219_v18, %v1218_v42 }
0x13b7   :  { %v1226_v41 = vadd.f32 %v1225_v63, %v1224_v62  ;;  %1524 = vrcp.f32 %v1220_v0 }
0x13b9   :  { %1526 = vrcp.f32 %v1226_v41 }
0x13c1   :  { %v1525_v2 = vpop.eup %1524 }
0x13c2   :  { %v1229_v3 = vmul.f32 %v1525_v2, %v1521_v51 }
0x13c3   :  { %v1527_v4 = vpop.eup %1526 }
0x13c4   :  { %v1230_v5 = vmul.f32 %v1527_v4, %v1523_v58  ;;  %v1231_v38 = vmul.f32 %v1229_v3, %v1644_v35 }
0x13c6   :  { %v1232_v1 = vmul.f32 %v1230_v5, %v1648_v39  ;;  %v1233_v6 = vsel %vm174_vm3, %v1231_v38, 0.0 }
0x13c7   :  { %v1234_v7 = vrot.slane %v1233_v6, 4 }
0x13c8   :  { %v1240_v8 = vsel %vm174_vm3, %v1232_v1, 0.0 }
0x13c9   :  { %v1235_v9 = vadd.f32 %v1234_v7, %v1233_v6  ;;  %v1241_v10 = vrot.slane %v1240_v8, 4 }
0x13cb   :  { %v1236_v11 = vrot.slane %v1235_v9, 2  ;;  %v1242_v12 = vadd.f32 %v1241_v10, %v1240_v8 }
0x13cd   :  { %v1237_v13 = vadd.f32 %v1236_v11, %v1235_v9  ;;  %v1243_v15 = vrot.slane %v1242_v12, 2 }
0x13cf   :  { %v1238_v16 = vrot.slane %v1237_v13, 1  ;;  %v1244_v17 = vadd.f32 %v1243_v15, %v1242_v12 }
0x13d1   :  { %v1245_v19 = vrot.slane %v1244_v17, 1  ;;  %v1239_v20 = vadd.f32 %v1238_v16, %v1237_v13 }
0x13d3   :  { %v1246_v21 = vadd.f32 %v1245_v19, %v1244_v17  ;;  %v1247_v39 = vmul.f32 %v1239_v20, %v1691_v43 }
0x13d5   :  { %v1248_v35 = vmul.f32 %v1246_v21, %v1691_v43 }
0x13d7   :  { %v1251_v22 = vrot.slane %v1248_v35, 7 }
0x13d9   :  { %v1252_v23 = vsel %vm423_vm4, %v1251_v22, %v1247_v39 }
0x13da   :  { %v1254_v24 = vsel %vm426_vm5, %v1252_v23, 0.0 }
0x13db   :  { %1255 = vadd.xlane.f32.xlu0 %v1254_v24 }
0x13f1   :  { %1258 = vrot.lane.b32.xlu0 %v1763_v30, %s1562_s18 }
0x1468   :  { %v1256_v26 = vpop.xlane.xlu0 %1255 }
0x1469   :  { %v1257_v27 = vadd.f32 %v1256_v26, %v1716_v59 }
0x146b   :  { %1265 = vrot.lane.b32.xlu1 %v1257_v27, %s1563_s19 }
0x146c   :  { %v1259_v28 = vpop.permute.xlu0 %1258 }
0x146d   :  { %v1269_v60 = vsel %vm1268_vm11, %v1719_v61, %v1259_v28 }
0x146e   :  { %v1271_v43 = vsel %vm1270_vm12, %v1269_v60, %v1262_v29 }
0x14dd   :  { %v1266_v25 = vpop.permute.xlu1 %1265 }
0x14de   :  { %v1273_v31 = vsel %vm1272_vm13, %v1271_v43, %v1266_v25 }
0x14df   :  { %1275 = vst.msk [vmem:[#allocation2] sm:$0x3] %vm1274_vm14, %v1273_v31 }
0x14e0   :  { %1539 = shalt.err (!%p1536_p4)
}
0x14e1   :  { %s1540_s0 = scalar_lea.hbm %s1859_s4, 32 }
0x14e2   :  { %p1541_p5 = scmp.ne.s32.totalorder %s1859_s4, %s1540_s0  ;;  %p1544_p6 = scmp.lt.u32.totalorder %s1540_s0, %s1859_s4 }
0x14e4   :  { %p1546_p7 = pnand %p1544_p6, %p1541_p5 }
0x14e6   :  { %1549 = shalt.err (!%p1546_p7)
}
0x14e7   :  { %1285 = dma.vmem_to_hbm [thread:$0]  %s1283_s21, 32, %s1859_s4, [#allocation3]  }
0x14e8   :  { %1550 = dma.done.wait [#allocation3], 32  }
0x14e9   :  { %1551 = vsyncadd [#allocation3], 4294967264 }
0x14ea   :  { %1289 = vsyncpa [#allocation3], 1 }

</bundles_post_ra>
